<compile_context>
chip_gen: v7x
topology: tpu7x:2x2x1
jax: 0.10.0
libtpu: 0.0.40
codegen_flags: <defaults>
</compile_context>

<pallas_src>
import jax
import jax.numpy as jnp
from jax import lax
from jax.experimental import pallas as pl
from jax.experimental.pallas import tpu as pltpu

LN_EPS = 1e-5            # torch.nn.LayerNorm default
LANE = 128
SUBLANE = 8
VMEM_BUDGET_BYTES = 48 << 20   # conservative: fits v7x's 64 MiB per-TC VMEM
VMEM_LIMIT_CAP = 56 << 20


def _round_up(x, m):
    return ((x + m - 1) // m) * m


def _pad2(a, rows, cols):
    r, c = a.shape
    return jnp.pad(a, ((0, rows - r), (0, cols - c)))


def _choose_tb(B, static_bytes, p_in, p_out, p_hid_max):
    """Largest lane-friendly batch tile that fits the VMEM budget; prefer
    keeping >=2 grid steps so the 'parallel' axis can use both v7x cores."""
    b8 = _round_up(B, SUBLANE)
    budget = VMEM_BUDGET_BYTES - static_bytes
    for tb in (512, 256, 128):
        if tb > b8:
            continue
        act_bytes = 4 * tb * (2 * (p_in + p_out) + 4 * p_hid_max)
        if act_bytes > budget:
            continue
        if pl.cdiv(B, tb) >= 2 or tb >= b8:
            return tb
    return min(b8, LANE)


def make_fused_mlp_kernel(hidden_real_dims, hidden_pad_dims, p_out, compute_dtype):
    """Fused (Linear + LayerNorm + Tanh)*N + Linear kernel.

    hidden_real_dims: true widths (LayerNorm divisors; padded lanes are 0).
    hidden_pad_dims:  lane-padded widths (slicing the packed vector array).
    """
    n_hidden = len(hidden_real_dims)

    def kernel(x_ref, *refs):
        out_ref = refs[-1]
        vecs_ref = refs[-2]            # (3N+1, p_vec) f32: [b,g,beta]*N + final b
        w_refs = refs[:-2]             # N+1 weight tiles, already in compute_dtype

        h = x_ref[...]                 # (TB, P_in) f32, padded lanes == 0
        for li in range(n_hidden):     # unrolled at trace time
            pd = hidden_pad_dims[li]
            # Linear (MXU): bf16/f32 inputs, f32 accumulate
            y = jnp.dot(h.astype(compute_dtype), w_refs[li][...],
                        preferred_element_type=jnp.float32)
            b    = vecs_ref[3 * li + 0: 3 * li + 1, :pd]
            g    = vecs_ref[3 * li + 1: 3 * li + 2, :pd]
            beta = vecs_ref[3 * li + 2: 3 * li + 3, :pd]
            y = y + b                  # padded lanes stay exactly 0 (f32)
            # LayerNorm over the real feature count, strictly in f32
            inv_d = 1.0 / float(hidden_real_dims[li])
            mu = jnp.sum(y, axis=-1, keepdims=True) * inv_d
            ey2 = jnp.sum(y * y, axis=-1, keepdims=True) * inv_d
            var = ey2 - mu * mu        # single-pass variance
            y_hat = (y - mu) * lax.rsqrt(var + LN_EPS)
            # gamma/beta are zero in padded lanes -> padded lanes return to 0
            y_hat = y_hat * g + beta
            # Tanh (EUP); dropout is identity in eval mode
            h = jnp.tanh(y_hat)

        bf = vecs_ref[3 * n_hidden: 3 * n_hidden + 1, :p_out]
        y = jnp.dot(h.astype(compute_dtype), w_refs[n_hidden][...],
                    preferred_element_type=jnp.float32)
        out_ref[...] = (y + bf).astype(out_ref.dtype)

    return kernel


def build_mlp_forward(input_size, hidden_sizes, output_size,
                      compute_dtype=jnp.float32):
    """Returns a jitted forward(x, weights, vecs) -> (B, output_size)."""
    p_in = _round_up(input_size, LANE)
    p_hid = tuple(_round_up(d, LANE) for d in hidden_sizes)
    p_out = _round_up(output_size, LANE)
    p_hid_max = max(p_hid + (p_in, p_out))
    kernel = make_fused_mlp_kernel(tuple(hidden_sizes), p_hid, p_out,
                                   compute_dtype)

    def forward(x, weights, vecs):
        B = x.shape[0]
        # Resident (single-buffered) parameter bytes.
        static_bytes = sum(int(w.size) * w.dtype.itemsize for w in weights)
        static_bytes += int(vecs.size) * vecs.dtype.itemsize

        tb = _choose_tb(B, static_bytes, p_in, p_out, p_hid_max)
        grid = (pl.cdiv(B, tb),)

        # Feature-dim pad only (lane alignment); no batch pad -> ragged last
        # tile is masked out on writeback by Pallas.
        x_f = x.astype(jnp.float32)
        if input_size != p_in:
            x_f = jnp.pad(x_f, ((0, 0), (0, p_in - input_size)))

        # Grid-invariant parameters: fetch once, single VMEM buffer each.
        def resident(shape):
            return pl.BlockSpec(shape, lambda i: (0,) * len(shape),
                                pipeline_mode=pl.Buffered(1))

        in_specs = [pl.BlockSpec((tb, p_in), lambda i: (i, 0))]
        in_specs += [resident(w.shape) for w in weights]
        in_specs += [resident(vecs.shape)]
        out_specs = pl.BlockSpec((tb, p_out), lambda i: (i, 0))

        act_bytes = 4 * tb * (2 * (p_in + p_out) + 4 * p_hid_max)
        vmem_limit = min(max(int(1.35 * (static_bytes + act_bytes)), 16 << 20),
                         VMEM_LIMIT_CAP)

        out = pl.pallas_call(
            kernel,
            out_shape=jax.ShapeDtypeStruct((B, p_out), jnp.float32),
            grid=grid,
            in_specs=in_specs,
            out_specs=out_specs,
            compiler_params=pltpu.CompilerParams(
                dimension_semantics=("parallel",),
                vmem_limit_bytes=vmem_limit),
        )(x_f, *weights, vecs)
        # Lane-dense output slab; slice back to the real output width here.
        return out[:, :output_size]

    return jax.jit(forward)


def init_custom_mlp_params(key, input_size, hidden_sizes, output_size):
    """Unpadded params mimicking torch defaults: Linear U(-1/sqrt(fan_in), ..),
    LayerNorm gamma=1 / beta=0. Weights stored as (in, out)."""
    params = []
    dims = [input_size] + list(hidden_sizes)
    for i in range(len(hidden_sizes)):
        din, dout = dims[i], dims[i + 1]
        key, kw, kb = jax.random.split(key, 3)
        bound = 1.0 / jnp.sqrt(din)
        w = jax.random.uniform(kw, (din, dout), jnp.float32, -bound, bound)
        b = jax.random.uniform(kb, (1, dout), jnp.float32, -bound, bound)
        gamma = jnp.ones((1, dout), jnp.float32)
        beta = jnp.zeros((1, dout), jnp.float32)
        params.append(("hidden", w, b, gamma, beta))
    din, dout = hidden_sizes[-1], output_size
    key, kw, kb = jax.random.split(key, 3)
    bound = 1.0 / jnp.sqrt(din)
    w = jax.random.uniform(kw, (din, dout), jnp.float32, -bound, bound)
    b = jax.random.uniform(kb, (1, dout), jnp.float32, -bound, bound)
    params.append(("final", w, b))
    return params


def pad_params(params, compute_dtype=jnp.float32):
    """Zero-pad weights to lane-multiple dims (cast to compute_dtype) and pack
    all per-layer vectors into one (3N+1, p_vec) f32 array:
      rows 3i..3i+2 = (bias, gamma, beta) of hidden layer i; last row = final bias.
    Zero padding (including gamma/beta) keeps padded activation lanes exactly 0."""
    p_vec = max(_round_up(p[1].shape[1], LANE) for p in params)
    weights, vec_rows = [], []
    for p in params:
        if p[0] == "hidden":
            _, w, b, g, beta = p
            extra = (g, beta)
        else:
            _, w, b = p
            extra = ()
        din, dout = w.shape
        pdin, pdout = _round_up(din, LANE), _round_up(dout, LANE)
        weights.append(_pad2(w, pdin, pdout).astype(compute_dtype))
        vec_rows.append(_pad2(b, 1, p_vec))
        for v in extra:
            vec_rows.append(_pad2(v, 1, p_vec))
    vecs = jnp.concatenate(vec_rows, axis=0).astype(jnp.float32)
    return tuple(weights), vecs


def ref_forward(x, params):
    h = x
    for p in params:
        if p[0] == "hidden":
            _, w, b, g, beta = p
            y = h @ w + b
            mu = jnp.mean(y, axis=-1, keepdims=True)
            var = jnp.mean((y - mu) ** 2, axis=-1, keepdims=True)
            y = (y - mu) / jnp.sqrt(var + LN_EPS) * g + beta
            h = jnp.tanh(y)
        else:
            _, w, b = p
            h = h @ w + b
    return h


if __name__ == "__main__":
    batch = 8
    input_size = 32
    hidden_sizes = [64, 64]
    output_size = 16

    key = jax.random.PRNGKey(0)
    key, kx = jax.random.split(key)
    x = jax.random.normal(kx, (batch, input_size), jnp.float32)

    params = init_custom_mlp_params(key, input_size, hidden_sizes, output_size)
    ref = ref_forward(x, params)

    # f32 path: exact parity with the f32 reference.
    w32, v32 = pad_params(params, jnp.float32)
    fwd32 = build_mlp_forward(input_size, hidden_sizes, output_size, jnp.float32)
    out32 = jax.block_until_ready(fwd32(x, w32, v32))
    assert out32.shape == (batch, output_size)
    assert jnp.allclose(out32, ref, atol=1e-4, rtol=1e-4), (
        float(jnp.max(jnp.abs(out32 - ref))))

    # bf16-weights/activations path (recommended for v5e/v6e/v7x MXU throughput;
    # LayerNorm math stays f32). Looser tolerance is the accuracy/speed tradeoff.
    wbf, vbf = pad_params(params, jnp.bfloat16)
    fwdbf = build_mlp_forward(input_size, hidden_sizes, output_size, jnp.bfloat16)
    outbf = jax.block_until_ready(fwdbf(x, wbf, vbf))
    assert outbf.shape == (batch, output_size)
    assert jnp.allclose(outbf, ref, atol=5e-2, rtol=5e-2), (
        float(jnp.max(jnp.abs(outbf - ref))))

    print("KERNEL_OK")
</pallas_src>

<mosaic_0001>
module attributes {stable_mosaic.version = 11 : i64} {
  func.func @kernel(%arg0: i32, %arg1: memref<8x128xf32, #tpu.memory_space<vmem>>, %arg2: memref<128x128xf32, #tpu.memory_space<vmem>>, %arg3: memref<128x128xf32, #tpu.memory_space<vmem>>, %arg4: memref<128x128xf32, #tpu.memory_space<vmem>>, %arg5: memref<7x128xf32, #tpu.memory_space<vmem>>, %arg6: memref<8x128xf32, #tpu.memory_space<vmem>>) attributes {dimension_semantics = [#tpu.dimension_semantics<parallel>], iteration_bounds = array<i64: 1>, scalar_prefetch = 0 : i64, scratch_operands = 0 : i64, tpu.core_type = #tpu.core_type<tc>, window_params = [{transform_indices = @transform_0, window_bounds = array<i64: 8, 128>}, {pipeline_mode = #tpu.pipeline_mode<synchronous>, transform_indices = @transform_1, window_bounds = array<i64: 128, 128>}, {pipeline_mode = #tpu.pipeline_mode<synchronous>, transform_indices = @transform_2, window_bounds = array<i64: 128, 128>}, {pipeline_mode = #tpu.pipeline_mode<synchronous>, transform_indices = @transform_3, window_bounds = array<i64: 128, 128>}, {pipeline_mode = #tpu.pipeline_mode<synchronous>, transform_indices = @transform_4, window_bounds = array<i64: 7, 128>}, {transform_indices = @transform_5, window_bounds = array<i64: 8, 128>}]} {
    %c0 = arith.constant 0 : index
    %c0_0 = arith.constant 0 : index
    %0 = vector.load %arg1[%c0, %c0_0] : memref<8x128xf32, #tpu.memory_space<vmem>>, vector<8x128xf32>
    %c0_1 = arith.constant 0 : index
    %c0_2 = arith.constant 0 : index
    %1 = vector.load %arg2[%c0_1, %c0_2] : memref<128x128xf32, #tpu.memory_space<vmem>>, vector<128x128xf32>
    %cst = arith.constant dense<0.000000e+00> : vector<8x128xf32>
    %2 = tpu.matmul %0, %1, %cst {dimension_numbers = #tpu.dot_dimension_numbers<[1], [0], [0], [1], [0, 0, 1, 1], [], []>} : vector<8x128xf32>, vector<128x128xf32>, vector<8x128xf32> -> vector<8x128xf32>
    %c0_3 = arith.constant 0 : index
    %c0_4 = arith.constant 0 : index
    %3 = vector.load %arg5[%c0_3, %c0_4] : memref<7x128xf32, #tpu.memory_space<vmem>>, vector<1x128xf32>
    %c1 = arith.constant 1 : index
    %c0_5 = arith.constant 0 : index
    %4 = vector.load %arg5[%c1, %c0_5] : memref<7x128xf32, #tpu.memory_space<vmem>>, vector<1x128xf32>
    %c2 = arith.constant 2 : index
    %c0_6 = arith.constant 0 : index
    %5 = vector.load %arg5[%c2, %c0_6] : memref<7x128xf32, #tpu.memory_space<vmem>>, vector<1x128xf32>
    %6 = vector.broadcast %3 : vector<1x128xf32> to vector<8x128xf32>
    %7 = arith.addf %2, %6 : vector<8x128xf32>
    %cst_7 = arith.constant dense<0.000000e+00> : vector<8xf32>
    %8 = vector.multi_reduction <add>, %7, %cst_7 [1] : vector<8x128xf32> to vector<8xf32>
    %9 = vector.shape_cast %8 : vector<8xf32> to vector<8x1xf32>
    %cst_8 = arith.constant 1.562500e-02 : f32
    %10 = vector.broadcast %cst_8 : f32 to vector<8x1xf32>
    %11 = arith.mulf %9, %10 : vector<8x1xf32>
    %12 = arith.mulf %7, %7 : vector<8x128xf32>
    %cst_9 = arith.constant dense<0.000000e+00> : vector<8xf32>
    %13 = vector.multi_reduction <add>, %12, %cst_9 [1] : vector<8x128xf32> to vector<8xf32>
    %14 = vector.shape_cast %13 : vector<8xf32> to vector<8x1xf32>
    %cst_10 = arith.constant 1.562500e-02 : f32
    %15 = vector.broadcast %cst_10 : f32 to vector<8x1xf32>
    %16 = arith.mulf %14, %15 : vector<8x1xf32>
    %17 = arith.mulf %11, %11 : vector<8x1xf32>
    %18 = arith.subf %16, %17 : vector<8x1xf32>
    %19 = vector.broadcast %11 : vector<8x1xf32> to vector<8x128xf32>
    %20 = arith.subf %7, %19 : vector<8x128xf32>
    %cst_11 = arith.constant 9.99999974E-6 : f32
    %21 = vector.broadcast %cst_11 : f32 to vector<8x1xf32>
    %22 = arith.addf %18, %21 : vector<8x1xf32>
    %23 = math.rsqrt %22 : vector<8x1xf32>
    %24 = vector.broadcast %23 : vector<8x1xf32> to vector<8x128xf32>
    %25 = arith.mulf %20, %24 : vector<8x128xf32>
    %26 = vector.broadcast %4 : vector<1x128xf32> to vector<8x128xf32>
    %27 = arith.mulf %25, %26 : vector<8x128xf32>
    %28 = vector.broadcast %5 : vector<1x128xf32> to vector<8x128xf32>
    %29 = arith.addf %27, %28 : vector<8x128xf32>
    %30 = math.tanh %29 : vector<8x128xf32>
    %c0_12 = arith.constant 0 : index
    %c0_13 = arith.constant 0 : index
    %31 = vector.load %arg3[%c0_12, %c0_13] : memref<128x128xf32, #tpu.memory_space<vmem>>, vector<128x128xf32>
    %cst_14 = arith.constant dense<0.000000e+00> : vector<8x128xf32>
    %32 = tpu.matmul %30, %31, %cst_14 {dimension_numbers = #tpu.dot_dimension_numbers<[1], [0], [0], [1], [0, 0, 1, 1], [], []>} : vector<8x128xf32>, vector<128x128xf32>, vector<8x128xf32> -> vector<8x128xf32>
    %c3 = arith.constant 3 : index
    %c0_15 = arith.constant 0 : index
    %33 = vector.load %arg5[%c3, %c0_15] : memref<7x128xf32, #tpu.memory_space<vmem>>, vector<1x128xf32>
    %c4 = arith.constant 4 : index
    %c0_16 = arith.constant 0 : index
    %34 = vector.load %arg5[%c4, %c0_16] : memref<7x128xf32, #tpu.memory_space<vmem>>, vector<1x128xf32>
    %c5 = arith.constant 5 : index
    %c0_17 = arith.constant 0 : index
    %35 = vector.load %arg5[%c5, %c0_17] : memref<7x128xf32, #tpu.memory_space<vmem>>, vector<1x128xf32>
    %36 = vector.broadcast %33 : vector<1x128xf32> to vector<8x128xf32>
    %37 = arith.addf %32, %36 : vector<8x128xf32>
    %cst_18 = arith.constant dense<0.000000e+00> : vector<8xf32>
    %38 = vector.multi_reduction <add>, %37, %cst_18 [1] : vector<8x128xf32> to vector<8xf32>
    %39 = vector.shape_cast %38 : vector<8xf32> to vector<8x1xf32>
    %cst_19 = arith.constant 1.562500e-02 : f32
    %40 = vector.broadcast %cst_19 : f32 to vector<8x1xf32>
    %41 = arith.mulf %39, %40 : vector<8x1xf32>
    %42 = arith.mulf %37, %37 : vector<8x128xf32>
    %cst_20 = arith.constant dense<0.000000e+00> : vector<8xf32>
    %43 = vector.multi_reduction <add>, %42, %cst_20 [1] : vector<8x128xf32> to vector<8xf32>
    %44 = vector.shape_cast %43 : vector<8xf32> to vector<8x1xf32>
    %cst_21 = arith.constant 1.562500e-02 : f32
    %45 = vector.broadcast %cst_21 : f32 to vector<8x1xf32>
    %46 = arith.mulf %44, %45 : vector<8x1xf32>
    %47 = arith.mulf %41, %41 : vector<8x1xf32>
    %48 = arith.subf %46, %47 : vector<8x1xf32>
    %49 = vector.broadcast %41 : vector<8x1xf32> to vector<8x128xf32>
    %50 = arith.subf %37, %49 : vector<8x128xf32>
    %cst_22 = arith.constant 9.99999974E-6 : f32
    %51 = vector.broadcast %cst_22 : f32 to vector<8x1xf32>
    %52 = arith.addf %48, %51 : vector<8x1xf32>
    %53 = math.rsqrt %52 : vector<8x1xf32>
    %54 = vector.broadcast %53 : vector<8x1xf32> to vector<8x128xf32>
    %55 = arith.mulf %50, %54 : vector<8x128xf32>
    %56 = vector.broadcast %34 : vector<1x128xf32> to vector<8x128xf32>
    %57 = arith.mulf %55, %56 : vector<8x128xf32>
    %58 = vector.broadcast %35 : vector<1x128xf32> to vector<8x128xf32>
    %59 = arith.addf %57, %58 : vector<8x128xf32>
    %60 = math.tanh %59 : vector<8x128xf32>
    %c6 = arith.constant 6 : index
    %c0_23 = arith.constant 0 : index
    %61 = vector.load %arg5[%c6, %c0_23] : memref<7x128xf32, #tpu.memory_space<vmem>>, vector<1x128xf32>
    %c0_24 = arith.constant 0 : index
    %c0_25 = arith.constant 0 : index
    %62 = vector.load %arg4[%c0_24, %c0_25] : memref<128x128xf32, #tpu.memory_space<vmem>>, vector<128x128xf32>
    %cst_26 = arith.constant dense<0.000000e+00> : vector<8x128xf32>
    %63 = tpu.matmul %60, %62, %cst_26 {dimension_numbers = #tpu.dot_dimension_numbers<[1], [0], [0], [1], [0, 0, 1, 1], [], []>} : vector<8x128xf32>, vector<128x128xf32>, vector<8x128xf32> -> vector<8x128xf32>
    %64 = vector.broadcast %61 : vector<1x128xf32> to vector<8x128xf32>
    %65 = arith.addf %63, %64 : vector<8x128xf32>
    %c0_27 = arith.constant 0 : index
    %c0_28 = arith.constant 0 : index
    %66 = vector.load %arg6[%c0_27, %c0_28] : memref<8x128xf32, #tpu.memory_space<vmem>>, vector<8x128xf32>
    tpu.vector_store %arg6[%c0_27, %c0_28], %65 {strides = array<i32>} : memref<8x128xf32, #tpu.memory_space<vmem>>, vector<8x128xf32>,
    return
  }
  func.func @transform_0(%arg0: i32) -> (i32, i32) {
    %c0_i32 = arith.constant 0 : i32
    %c0_i32_0 = arith.constant 0 : i32
    return %arg0, %c0_i32 : i32, i32
  }
  func.func @transform_1(%arg0: i32) -> (i32, i32) {
    %c0_i32 = arith.constant 0 : i32
    %c0_i32_0 = arith.constant 0 : i32
    %c0_i32_1 = arith.constant 0 : i32
    return %c0_i32, %c0_i32_0 : i32, i32
  }
  func.func @transform_2(%arg0: i32) -> (i32, i32) {
    %c0_i32 = arith.constant 0 : i32
    %c0_i32_0 = arith.constant 0 : i32
    %c0_i32_1 = arith.constant 0 : i32
    return %c0_i32, %c0_i32_0 : i32, i32
  }
  func.func @transform_3(%arg0: i32) -> (i32, i32) {
    %c0_i32 = arith.constant 0 : i32
    %c0_i32_0 = arith.constant 0 : i32
    %c0_i32_1 = arith.constant 0 : i32
    return %c0_i32, %c0_i32_0 : i32, i32
  }
  func.func @transform_4(%arg0: i32) -> (i32, i32) {
    %c0_i32 = arith.constant 0 : i32
    %c0_i32_0 = arith.constant 0 : i32
    %c0_i32_1 = arith.constant 0 : i32
    return %c0_i32, %c0_i32_0 : i32, i32
  }
  func.func @transform_5(%arg0: i32) -> (i32, i32) {
    %c0_i32 = arith.constant 0 : i32
    %c0_i32_0 = arith.constant 0 : i32
    return %arg0, %c0_i32 : i32, i32
  }
}

</mosaic_0001>

<bundles_post_ra>
// kernel: forward.1
= control target key start
LH: loop header
LB: loop body
LE: loop exit
PB: predicated region body
PF: predicated region fallthrough
CT: control target
= control target key end

     0   :  { %10 = vsyncpa [#allocation3], 0  ;;  %s905_s0 = inlined_call_operand.vmem [shape: f32[8,128], index: 0, kind: input, shape index: {}]   ;;  %s906_s1 = inlined_call_operand.hbm [shape: f32[128,128], index: 1, kind: input, shape index: {}]   ;;  %s907_s2 = inlined_call_operand.hbm [shape: f32[128,128], index: 2, kind: input, shape index: {}]   ;;  %s908_s3 = inlined_call_operand.hbm [shape: f32[128,128], index: 3, kind: input, shape index: {}]   ;;  %s909_s4 = inlined_call_operand.vmem [shape: f32[7,128], index: 4, kind: input, shape index: {}]   ;;  %s910_s5 = inlined_call_operand.hbm [shape: f32[8,128], index: 5, kind: output, shape index: {}]  }
   0x1   :  { %11 = vsyncpa [#allocation6], 0 }
   0x2   :  { %12 = vsyncpa [#allocation4], 0  ;;  %s751_s18 = smov [#allocation5]   ;;  %s752_s20 = smov [#allocation2]  }
   0x3   :  { %s32_s19 = sshll.u32 %s751_s18, 4  ;;  %s20_s21 = sshll.u32 %s752_s20, 4  ;;  %s33_s19 = int_to_ptr.vmem [resolvable:$true] %s32_s19  ;;  %s790_s21 = int_to_ptr.vmem [resolvable:$true] %s20_s21 }
   0x4   :  { %s657_s24 = scalar_lea.hbm %s907_s2, 2048 }
   0x5   :  { %p658_p0 = scmp.ne.s32.totalorder %s907_s2, %s657_s24  ;;  %p661_p1 = scmp.lt.u32.totalorder %s657_s24, %s907_s2 }
   0x7   :  { %p663_p2 = pnand %p661_p1, %p658_p0 }
   0x9   :  { %666 = shalt.err (!%p663_p2)
}
   0xa   :  { %s667_s29 = scalar_lea.vmem %s33_s19, 2048  ;;  %p672_p4 = scmp.lt.s32.totalorder %s33_s19, %s33_s19 }
   0xb   :  { %p668_p3 = scmp.ne.s32.totalorder %s33_s19, %s667_s29  ;;  %p673_p5 = scmp.lt.s32.totalorder %s667_s29, %s667_s29 }
   0xd   :  { %p674_p6 = por %p673_p5, %p672_p4 }
   0xf   :  { %p675_p7 = pnand %p674_p6, %p668_p3 }
  0x11   :  { %678 = shalt.err (!%p675_p7)
}
  0x12   :  { %s753_s30 = smov 128   ;;  %s754_s6 = smov 8  }
  0x13   :  { %38 = dma.hbm_to_vmem [thread:$0]  %s907_s2, 2048, %s33_s19, [#allocation6], %s753_s30, %s753_s30, %s754_s6  }
  0x14   :  { %s679_s11 = scalar_lea.hbm %s906_s1, 2048 }
  0x15   :  { %p680_p8 = scmp.ne.s32.totalorder %s906_s1, %s679_s11  ;;  %p683_p9 = scmp.lt.u32.totalorder %s679_s11, %s906_s1 }
  0x17   :  { %p685_p10 = pnand %p683_p9, %p680_p8 }
  0x19   :  { %688 = shalt.err (!%p685_p10)
}
  0x1a   :  { %s689_s16 = scalar_lea.vmem %s790_s21, 2048  ;;  %p694_p12 = scmp.lt.s32.totalorder %s790_s21, %s790_s21 }
  0x1b   :  { %p690_p11 = scmp.ne.s32.totalorder %s790_s21, %s689_s16  ;;  %p695_p13 = scmp.lt.s32.totalorder %s689_s16, %s689_s16 }
  0x1d   :  { %p696_p0 = por %p695_p13, %p694_p12 }
  0x1f   :  { %p697_p1 = pnand %p696_p0, %p690_p11 }
  0x21   :  { %700 = shalt.err (!%p697_p1)
}
  0x22   :  { %26 = dma.hbm_to_vmem [thread:$0]  %s906_s1, 2048, %s790_s21, [#allocation3], %s753_s30, %s753_s30, %s754_s6  }
  0x23   :  { %s755_s18 = smov [#allocation7]   ;;  %s701_s23 = scalar_lea.hbm %s908_s3, 2048 }
  0x24   :  { %s44_s19 = sshll.u32 %s755_s18, 4  ;;  %p702_p2 = scmp.ne.s32.totalorder %s908_s3, %s701_s23  ;;  %s45_s19 = int_to_ptr.vmem [resolvable:$true] %s44_s19 }
  0x25   :  { %p705_p3 = scmp.lt.u32.totalorder %s701_s23, %s908_s3 }
  0x27   :  { %p707_p4 = pnand %p705_p3, %p702_p2 }
  0x29   :  { %710 = shalt.err (!%p707_p4)
}
  0x2a   :  { %s711_s28 = scalar_lea.vmem %s45_s19, 2048  ;;  %p716_p6 = scmp.lt.s32.totalorder %s45_s19, %s45_s19 }
  0x2b   :  { %p712_p5 = scmp.ne.s32.totalorder %s45_s19, %s711_s28  ;;  %p717_p7 = scmp.lt.s32.totalorder %s711_s28, %s711_s28 }
  0x2d   :  { %p718_p8 = por %p717_p7, %p716_p6 }
  0x2f   :  { %p719_p9 = pnand %p718_p8, %p712_p5 }
  0x31   :  { %722 = shalt.err (!%p719_p9)
}
  0x32   :  { %50 = dma.hbm_to_vmem [thread:$0]  %s908_s3, 2048, %s45_s19, [#allocation6], %s753_s30, %s753_s30, %s754_s6  }
  0x33   :  { %745 = dma.done.wait [#allocation3], 2048  }
  0x34   :  { %746 = vsyncadd [#allocation3], 4294965248 }
  0x35   :  { %747 = dma.done.wait [#allocation6], 4096  }
  0x36   :  { %748 = vsyncadd [#allocation6], 4294963200  ;;  %v756_v0 = vmov 0.0|0.0   ;;  %vm757_vm0 = vmmov 0   ;;  %v758_v1 = vmov 0.0   ;;  %v63_v2 = vld [vmem:[#allocation2] sm:$0xff] }
  0x37   :  { %568 = vmatprep.subr.bf16.mxu0 %v756_v0  ;;  %495 = vmatprep.mubr.msk.f32.mxu0 %vm757_vm0, %v758_v1  ;;  %v64_v3 = vld [vmem:[#allocation2 + $0x8] sm:$0xff]  ;;  %v65_v4 = vld [vmem:[#allocation2 + $0x10] sm:$0xff]  ;;  %v66_v6 = vld [vmem:[#allocation2 + $0x18] sm:$0xff]  ;;  %s759_s17 = smov [#allocation8]  }
  0x38   :  { %592 = vmatprep.subr.bf16.mxu1 %v756_v0  ;;  %530 = vmatprep.mubr.msk.f32.mxu1 %vm757_vm0, %v758_v1  ;;  %v569_v5 = vpack.c.bf16 %v64_v3, %v63_v2  ;;  %v572_v7 = vpack.c.bf16 %v66_v6, %v65_v4  ;;  %v67_v8 = vld [vmem:[#allocation2 + $0x20] sm:$0xff]  ;;  %v68_v9 = vld [vmem:[#allocation2 + $0x28] sm:$0xff]  ;;  %v69_v11 = vld [vmem:[#allocation2 + $0x30] sm:$0xff]  ;;  %s395_s18 = sshll.u32 %s759_s17, 4  ;;  %s396_s18 = int_to_ptr.vmem [resolvable:$true] %s395_s18 }
  0x39   :  { %v575_v10 = vpack.c.bf16 %v68_v9, %v67_v8  ;;  %v70_v12 = vld [vmem:[#allocation2 + $0x38] sm:$0xff]  ;;  %v71_v14 = vld [vmem:[#allocation2 + $0x40] sm:$0xff]  ;;  %v72_v15 = vld [vmem:[#allocation2 + $0x48] sm:$0xff]  ;;  %s723_s19 = scalar_lea.vmem %s396_s18, 128  ;;  %p728_p11 = scmp.lt.s32.totalorder %s396_s18, %s396_s18 }
  0x3a   :  { %570 = vmatpush3.bf16.msra.mxu0 %v569_v5  ;;  %v578_v13 = vpack.c.bf16 %v70_v12, %v69_v11  ;;  %v581_v16 = vpack.c.bf16 %v72_v15, %v71_v14  ;;  %v73_v17 = vld [vmem:[#allocation2 + $0x50] sm:$0xff]  ;;  %v74_v18 = vld [vmem:[#allocation2 + $0x58] sm:$0xff]  ;;  %v75_v20 = vld [vmem:[#allocation2 + $0x60] sm:$0xff]  ;;  %p724_p10 = scmp.ne.s32.totalorder %s396_s18, %s723_s19  ;;  %p729_p12 = scmp.lt.s32.totalorder %s723_s19, %s723_s19 }
  0x3b   :  { %571 = vmatprep.subr.bf16.mxu0 %v756_v0  ;;  %v584_v19 = vpack.c.bf16 %v74_v18, %v73_v17  ;;  %v76_v21 = vld [vmem:[#allocation2 + $0x68] sm:$0xff]  ;;  %v77_v23 = vld [vmem:[#allocation2 + $0x70] sm:$0xff]  ;;  %v78_v24 = vld [vmem:[#allocation2 + $0x78] sm:$0xff] }
  0x3c   :  { %v587_v22 = vpack.c.bf16 %v76_v21, %v75_v20  ;;  %v590_v25 = vpack.c.bf16 %v78_v24, %v77_v23  ;;  %v62_v26 = vld [vmem:[%s905_s0] sm:$0xff]  ;;  %v180_v32 = vld [vmem:[#allocation5] sm:$0xff]  ;;  %v181_v33 = vld [vmem:[#allocation5 + $0x8] sm:$0xff]  ;;  %p730_p13 = por %p729_p12, %p728_p11 }
  0x3d   :  { %v405_v27 = vld [vmem:[%s909_s4] ss:$0 sm:$0xff]  ;;  %v593_v34 = vpack.c.bf16 %v181_v33, %v180_v32  ;;  %v183_v36 = vld [vmem:[#allocation5 + $0x18] sm:$0xff]  ;;  %v184_v38 = vld [vmem:[#allocation5 + $0x20] sm:$0xff] }
  0x3e   :  { %573 = vmatpush3.bf16.msra.mxu0 %v572_v7  ;;  %v182_v35 = vld [vmem:[#allocation5 + $0x10] sm:$0xff]  ;;  %v185_v39 = vld [vmem:[#allocation5 + $0x28] sm:$0xff]  ;;  %v187_v42 = vld [vmem:[#allocation5 + $0x38] sm:$0xff]  ;;  %p731_p0 = pnand %p730_p13, %p724_p10 }
  0x3f   :  { %574 = vmatprep.subr.bf16.mxu0 %v756_v0  ;;  %594 = vmatpush3.bf16.msra.mxu1 %v593_v34  ;;  %v596_v37 = vpack.c.bf16 %v183_v36, %v182_v35  ;;  %v599_v40 = vpack.c.bf16 %v185_v39, %v184_v38  ;;  %v186_v41 = vld [vmem:[#allocation5 + $0x30] sm:$0xff]  ;;  %v188_v44 = vld [vmem:[#allocation5 + $0x40] sm:$0xff]  ;;  %v189_v45 = vld [vmem:[#allocation5 + $0x48] sm:$0xff] }
  0x40   :  { %595 = vmatprep.subr.bf16.mxu1 %v756_v0  ;;  %v602_v43 = vpack.c.bf16 %v187_v42, %v186_v41  ;;  %v605_v46 = vpack.c.bf16 %v189_v45, %v188_v44  ;;  %v190_v47 = vld [vmem:[#allocation5 + $0x50] sm:$0xff]  ;;  %v191_v48 = vld [vmem:[#allocation5 + $0x58] sm:$0xff]  ;;  %v192_v50 = vld [vmem:[#allocation5 + $0x60] sm:$0xff] }
  0x41   :  { %v608_v49 = vpack.c.bf16 %v191_v48, %v190_v47  ;;  %v193_v51 = vld [vmem:[#allocation5 + $0x68] sm:$0xff]  ;;  %v194_v53 = vld [vmem:[#allocation5 + $0x70] sm:$0xff]  ;;  %v195_v54 = vld [vmem:[#allocation5 + $0x78] sm:$0xff] }
  0x42   :  { %576 = vmatpush3.bf16.msra.mxu0 %v575_v10  ;;  %v611_v52 = vpack.c.bf16 %v193_v51, %v192_v50  ;;  %v614_v55 = vpack.c.bf16 %v195_v54, %v194_v53  ;;  %v406_v2 = vld [vmem:[%s909_s4 + $0x1] ss:$0 sm:$0xff]  ;;  %v407_v4 = vld [vmem:[%s909_s4 + $0x2] ss:$0 sm:$0xff]  ;;  %v408_v8 = vld [vmem:[%s909_s4 + $0x3] ss:$0 sm:$0xff] }
  0x43   :  { %577 = vmatprep.subr.bf16.mxu0 %v756_v0  ;;  %597 = vmatpush3.bf16.msra.mxu1 %v596_v37  ;;  %v299_v14 = vld [vmem:[#allocation7 + $0x8] sm:$0xff]  ;;  %v301_v17 = vld [vmem:[#allocation7 + $0x18] sm:$0xff]  ;;  %v312_v34 = vld [vmem:[#allocation7 + $0x70] sm:$0xff] }
  0x44   :  { %598 = vmatprep.subr.bf16.mxu1 %v756_v0  ;;  %v303_v20 = vld [vmem:[#allocation7 + $0x28] sm:$0xff]  ;;  %v305_v23 = vld [vmem:[#allocation7 + $0x38] sm:$0xff]  ;;  %v411_v51 = vld [vmem:[%s909_s4 + $0x6] ss:$0 sm:$0xff] }
  0x45   :  { %v311_v32 = vld [vmem:[#allocation7 + $0x68] sm:$0xff]  ;;  %v313_v35 = vld [vmem:[#allocation7 + $0x78] sm:$0xff] }
  0x46   :  { %579 = vmatpush3.bf16.msra.mxu0 %v578_v13  ;;  %v298_v13 = vld [vmem:[#allocation7] sm:$0xff]  ;;  %v638_v36 = vpack.c.bf16 %v313_v35, %v312_v34 }
  0x47   :  { %580 = vmatprep.subr.bf16.mxu0 %v756_v0  ;;  %600 = vmatpush3.bf16.msra.mxu1 %v599_v40  ;;  %v617_v15 = vpack.c.bf16 %v299_v14, %v298_v13 }
  0x48   :  { %601 = vmatprep.subr.bf16.mxu1 %v756_v0 }
  0x4a   :  { %582 = vmatpush3.bf16.msra.mxu0 %v581_v16  ;;  %v300_v16 = vld [vmem:[#allocation7 + $0x10] sm:$0xff] }
  0x4b   :  { %583 = vmatprep.subr.bf16.mxu0 %v756_v0  ;;  %603 = vmatpush3.bf16.msra.mxu1 %v602_v43  ;;  %v620_v18 = vpack.c.bf16 %v301_v17, %v300_v16 }
  0x4c   :  { %604 = vmatprep.subr.bf16.mxu1 %v756_v0 }
  0x4e   :  { %585 = vmatpush3.bf16.msra.mxu0 %v584_v19  ;;  %v302_v19 = vld [vmem:[#allocation7 + $0x20] sm:$0xff] }
  0x4f   :  { %586 = vmatprep.subr.bf16.mxu0 %v756_v0  ;;  %606 = vmatpush3.bf16.msra.mxu1 %v605_v46  ;;  %v623_v21 = vpack.c.bf16 %v303_v20, %v302_v19  ;;  %v409_v46 = vld [vmem:[%s909_s4 + $0x4] ss:$0 sm:$0xff] }
  0x50   :  { %607 = vmatprep.subr.bf16.mxu1 %v756_v0 }
  0x52   :  { %588 = vmatpush3.bf16.msra.mxu0 %v587_v22  ;;  %v304_v22 = vld [vmem:[#allocation7 + $0x30] sm:$0xff] }
  0x53   :  { %589 = vmatprep.subr.bf16.mxu0 %v756_v0  ;;  %609 = vmatpush3.bf16.msra.mxu1 %v608_v49  ;;  %v626_v24 = vpack.c.bf16 %v305_v23, %v304_v22 }
  0x54   :  { %610 = vmatprep.subr.bf16.mxu1 %v756_v0 }
  0x56   :  { %591 = vmatpush3.bf16.msra.mxu0 %v590_v25  ;;  %v306_v25 = vld [vmem:[#allocation7 + $0x40] sm:$0xff] }
  0x57   :  { %616 = vmatprep.subr.bf16.mxu0 %v756_v0  ;;  %612 = vmatpush3.bf16.msra.mxu1 %v611_v52 }
  0x58   :  { %613 = vmatprep.subr.bf16.mxu1 %v756_v0 }
  0x59   :  { %496 = vmatmul.mubr.f32.vlgmr.msra.gmra.mrb[0].mxu0 %v62_v26  ;;  %v307_v26 = vld [vmem:[#allocation7 + $0x48] sm:$0xff] }
  0x5a   :  { %565 = vmatprep.mubr.msk.f32.mxu0 %vm757_vm0, %v758_v1  ;;  %618 = vmatpush3.bf16.msra.mxu0 %v617_v15 }
  0x5b   :  { %615 = vmatpush3.bf16.msra.mxu1 %v614_v55  ;;  %619 = vmatprep.subr.bf16.mxu0 %v756_v0 }
  0x5e   :  { %621 = vmatpush3.bf16.msra.mxu0 %v620_v18 }
  0x5f   :  { %622 = vmatprep.subr.bf16.mxu0 %v756_v0 }
  0x62   :  { %624 = vmatpush3.bf16.msra.mxu0 %v623_v21 }
  0x63   :  { %625 = vmatprep.subr.bf16.mxu0 %v756_v0 }
  0x66   :  { %627 = vmatpush3.bf16.msra.mxu0 %v626_v24 }
  0x67   :  { %628 = vmatprep.subr.bf16.mxu0 %v756_v0 }
 0x12c   :  { %v152_v28 = vpop.f32.mrb[0].mxu0 }
 0x12d   :  { %v153_v29 = vadd.f32 %v405_v27, %v152_v28  ;;  %v497_v30 = vpop.f32.mrb[1].mxu0  ;;  %v629_v27 = vpack.c.bf16 %v307_v26, %v306_v25  ;;  %v308_v28 = vld [vmem:[#allocation7 + $0x50] sm:$0xff] }
 0x12f   :  { %156 = vadd.xlane.f32.xlu0 %v153_v29  ;;  %v159_v31 = vmul.f32 %v153_v29, %v153_v29  ;;  %630 = vmatpush3.bf16.msra.mxu0 %v629_v27 }
 0x130   :  { %631 = vmatprep.subr.bf16.mxu0 %v756_v0 }
 0x133   :  { %160 = vadd.xlane.f32.xlu0 %v159_v31  ;;  %v310_v31 = vld [vmem:[#allocation7 + $0x60] sm:$0xff] }
 0x134   :  { %v635_v33 = vpack.c.bf16 %v311_v32, %v310_v31 }
 0x1bc   :  { %v157_v56 = vpop.xlane.xlu0 %156 }
 0x1bd   :  { %v158_v57 = vmul.f32 0.015625, %v157_v56 }
 0x1bf   :  { %v163_v59 = vmul.f32 %v158_v57, %v158_v57  ;;  %v165_v63 = vsub.f32 %v153_v29, %v158_v57  ;;  %v309_v29 = vld [vmem:[#allocation7 + $0x58] sm:$0xff] }
 0x1c0   :  { %v161_v58 = vpop.xlane.xlu0 %160  ;;  %v632_v30 = vpack.c.bf16 %v309_v29, %v308_v28 }
 0x1c1   :  { %v162_v60 = vmul.f32 0.015625, %v161_v58 }
 0x1c2   :  { %633 = vmatpush3.bf16.msra.mxu0 %v632_v30 }
 0x1c3   :  { %v164_v61 = vsub.f32 %v162_v60, %v163_v59  ;;  %634 = vmatprep.subr.bf16.mxu0 %v756_v0 }
 0x1c5   :  { %v166_v62 = vadd.f32 1e-05, %v164_v61 }
 0x1c6   :  { %636 = vmatpush3.bf16.msra.mxu0 %v635_v33 }
 0x1c7   :  { %649 = vrsqrt.f32 %v166_v62  ;;  %637 = vmatprep.subr.bf16.mxu0 %v756_v0  ;;  %v410_v0 = vld [vmem:[%s909_s4 + $0x5] ss:$0 sm:$0xff] }
 0x1ca   :  { %639 = vmatpush3.bf16.msra.mxu0 %v638_v36 }
 0x1d1   :  { %v650_v1 = vpop.eup %649 }
 0x1d2   :  { %v168_v3 = vmul.f32 %v650_v1, %v165_v63 }
 0x1d4   :  { %v173_v5 = vmul.f32 %v406_v2, %v168_v3 }
 0x1d6   :  { %v178_v6 = vadd.f32 %v407_v4, %v173_v5 }
 0x1d8   :  { %651 = vtanh.f32 %v178_v6 }
 0x1e2   :  { %v652_v7 = vpop.eup %651 }
 0x1e3   :  { %531 = vmatmul.mubr.f32.vlgmr.msra.gmra.mrb[0].mxu1 %v652_v7 }
 0x2b6   :  { %v269_v9 = vpop.f32.mrb[0].mxu1 }
 0x2b7   :  { %v270_v10 = vadd.f32 %v408_v8, %v269_v9  ;;  %v532_v11 = vpop.f32.mrb[1].mxu1 }
 0x2b9   :  { %273 = vadd.xlane.f32.xlu1 %v270_v10  ;;  %v276_v12 = vmul.f32 %v270_v10, %v270_v10 }
 0x2bd   :  { %277 = vadd.xlane.f32.xlu1 %v276_v12 }
 0x346   :  { %v274_v37 = vpop.xlane.xlu1 %273 }
 0x347   :  { %v275_v38 = vmul.f32 0.015625, %v274_v37 }
 0x349   :  { %v280_v40 = vmul.f32 %v275_v38, %v275_v38  ;;  %v282_v44 = vsub.f32 %v270_v10, %v275_v38 }
 0x34a   :  { %v278_v39 = vpop.xlane.xlu1 %277 }
 0x34b   :  { %v279_v41 = vmul.f32 0.015625, %v278_v39 }
 0x34d   :  { %v281_v42 = vsub.f32 %v279_v41, %v280_v40 }
 0x34f   :  { %v283_v43 = vadd.f32 1e-05, %v281_v42 }
 0x351   :  { %653 = vrsqrt.f32 %v283_v43 }
 0x35b   :  { %v654_v45 = vpop.eup %653 }
 0x35c   :  { %v285_v47 = vmul.f32 %v654_v45, %v282_v44 }
 0x35e   :  { %v290_v48 = vmul.f32 %v409_v46, %v285_v47 }
 0x360   :  { %v295_v49 = vadd.f32 %v410_v0, %v290_v48 }
 0x362   :  { %655 = vtanh.f32 %v295_v49 }
 0x36c   :  { %v656_v50 = vpop.eup %655 }
 0x36d   :  { %566 = vmatmul.mubr.f32.vlgmr.msra.gmra.mrb[2].mxu0 %v656_v50 }
 0x440   :  { %v384_v52 = vpop.f32.mrb[2].mxu0 }
 0x441   :  { %v385_v53 = vadd.f32 %v411_v51, %v384_v52  ;;  %v567_v54 = vpop.f32.mrb[3].mxu0 }
 0x443   :  { %388 = vst [vmem:[#allocation8] sm:$0xff] %v385_v53 }
 0x444   :  { %734 = shalt.err (!%p731_p0)
}
 0x445   :  { %s735_s23 = scalar_lea.hbm %s910_s5, 128 }
 0x446   :  { %p736_p1 = scmp.ne.s32.totalorder %s910_s5, %s735_s23  ;;  %p739_p2 = scmp.lt.u32.totalorder %s735_s23, %s910_s5 }
 0x448   :  { %p741_p3 = pnand %p739_p2, %p736_p1 }
 0x44a   :  { %744 = shalt.err (!%p741_p3)
}
 0x44b   :  { %398 = dma.vmem_to_hbm [thread:$0]  %s396_s18, 128, %s910_s5, [#allocation4]  }
 0x44c   :  { %749 = dma.done.wait [#allocation4], 128  }
 0x44d   :  { %750 = vsyncadd [#allocation4], 4294967168 }
 0x44e   :  { %402 = vsyncpa [#allocation3], 1 }
 0x44f   :  { %403 = vsyncpa [#allocation6], 1 }
 0x450   :  { %404 = vsyncpa [#allocation4], 1 }

</bundles_post_ra>
